<compile_context>
chip_gen: v7x
topology: tpu7x:2x2x1
jax: 0.10.0
libtpu: 0.0.40
codegen_flags: <defaults>
</compile_context>

<pallas_src>
import jax
import jax.numpy as jnp
from jax import lax
from jax.experimental import pallas as pl
from jax.experimental.pallas import tpu as pltpu

_LANE = 128
_BLOCK_BUDGET_BYTES = 6 * 1024 * 1024    # per x-block; x+out double-buffered -> ~4x
_VMEM_LIMIT_BYTES = 32 * 1024 * 1024     # explicit scoped-VMEM ceiling (<= v7x 64 MiB phys)


def _occlusion_kernel(x_ref, m_ref, o_ref):
    # x_ref/o_ref: (TBC, TL) tile of flattened images.
    # m_ref: (1, TL) occlusion-mask tile, broadcast over rows; resident across
    # the row axis of the grid (same block index for every row step).
    o_ref[...] = (x_ref[...] * m_ref[...]).astype(o_ref.dtype)


def _build_mask(H, W, idx_thr, cos_t, sin_t, dtype):
    """Rotated half-plane mask via inverse nearest-neighbor warp.

    Matches torchvision RandomRotation defaults (NEAREST, expand=False,
    fill=0 -> out-of-bounds pixels become 0, i.e. occluded).
    """
    yy = lax.broadcasted_iota(jnp.float32, (H, W), 0)
    xx = lax.broadcasted_iota(jnp.float32, (H, W), 1)
    cy = (H - 1) * 0.5
    cx = (W - 1) * 0.5
    dy = yy - cy
    dx = xx - cx
    src_x = cos_t * dx + sin_t * dy + cx
    src_y = -sin_t * dx + cos_t * dy + cy
    sx = jnp.round(src_x)
    sy = jnp.round(src_y)
    in_bounds = (sx >= 0.0) & (sx <= W - 1.0) & (sy >= 0.0) & (sy <= H - 1.0)
    # Un-rotated mask zeroes rows [idx:, :] -> keep source rows < idx.
    keep = in_bounds & (sy < idx_thr)
    return keep.astype(dtype)  # exact 0/1 values in x's dtype


def _choose_blocks(N, L, itemsize):
    """Pick (tbc, tl) honoring the VMEM budget, (8,128) tiling and megacore."""
    sub_align = 8 * max(1, 4 // itemsize)       # 8 f32, 16 bf16, 32 int8/fp8
    row_bytes = L * itemsize

    # Column tile: full L when a minimal row slab fits the budget (or when L
    # cannot be lane-tiled); otherwise a lane multiple sized so a
    # sub_align-row block stays within the budget.
    if (L % _LANE == 0) and (row_bytes * min(N, sub_align) > _BLOCK_BUDGET_BYTES):
        tl = (_BLOCK_BUDGET_BYTES // (sub_align * itemsize)) // _LANE * _LANE
        tl = min(max(_LANE, tl), L)
    else:
        # TODO(synk): very large images with H*W not a multiple of 128 fall back
        # to full-row blocks; repack/pad in the wrapper if that ever matters.
        tl = L

    # Row tile: as many sublane-aligned rows as the budget allows, capped at
    # ~half of N (when N is big enough) so dimension_semantics="parallel" has
    # >= 2 grid steps to shard across v7x's two TensorCores.
    if N <= sub_align:
        tbc = N
    else:
        rows_budget = max(sub_align, _BLOCK_BUDGET_BYTES // (tl * itemsize))
        tbc_cap = min(rows_budget, N)
        if N >= 2 * sub_align:
            half_rounded = (((N + 1) // 2 + sub_align - 1) // sub_align) * sub_align
            tbc_cap = min(tbc_cap, half_rounded)
        tbc = max(sub_align, (tbc_cap // sub_align) * sub_align)
    return tbc, tl


def random_occlusion(x, key, prob=0.5, size=(0.3, 0.5)):
    """JAX/Pallas port of Random_occlusion.forward (NCHW input)."""
    B, C, H, W = x.shape
    N = B * C
    L = H * W
    itemsize = jnp.dtype(x.dtype).itemsize

    k_apply, k_size, k_angle = jax.random.split(key, 3)
    apply_flag = jax.random.uniform(k_apply, ()) < prob
    size_rand = jax.random.uniform(k_size, ()) * (size[1] - size[0]) + size[0]
    idx_thr = jnp.ceil(H * (1.0 - size_rand)).astype(jnp.float32)
    # RandomRotation((-180, 180)): uniform angle in degrees.
    angle_deg = jax.random.uniform(k_angle, ()) * 360.0 - 180.0
    theta = angle_deg * (jnp.pi / 180.0)

    mask_flat = _build_mask(
        H, W, idx_thr, jnp.cos(theta), jnp.sin(theta), x.dtype
    ).reshape(1, L)
    x_flat = x.reshape(N, L)

    tbc, tl = _choose_blocks(N, L, itemsize)
    grid = (pl.cdiv(N, tbc), pl.cdiv(L, tl))

    kernel_fn = pl.pallas_call(
        _occlusion_kernel,
        out_shape=jax.ShapeDtypeStruct((N, L), x.dtype),
        grid_spec=pltpu.PrefetchScalarGridSpec(
            num_scalar_prefetch=0,
            grid=grid,
            in_specs=[
                pl.BlockSpec((tbc, tl), lambda i, j: (i, j)),
                # Constant block index along the row axis -> stays VMEM-resident
                # while rows stream; re-fetched only per (tiny) column tile.
                pl.BlockSpec((1, tl), lambda i, j: (0, j)),
            ],
            out_specs=pl.BlockSpec((tbc, tl), lambda i, j: (i, j)),
        ),
        compiler_params=pltpu.CompilerParams(
            dimension_semantics=("parallel", "parallel"),  # shard across TCs (v7x)
            vmem_limit_bytes=_VMEM_LIMIT_BYTES,
        ),
        # Output may reuse x's buffer (in-place multiply); pairs with jit-level
        # donation of x by callers for a truly copy-free identity branch.
        input_output_aliases={0: 0},
        cost_estimate=pl.CostEstimate(
            flops=N * L,
            transcendentals=0,
            bytes_accessed=(2 * N * L + L) * itemsize,
        ),
    )

    # Short-circuit the identity case: no HBM round trip when not applied.
    out_flat = lax.cond(
        apply_flag,
        lambda xf: kernel_fn(xf, mask_flat),
        lambda xf: xf,
        x_flat,
    )
    return out_flat.reshape(B, C, H, W)


def _reference(x, key, prob=0.5, size=(0.3, 0.5)):
    """Pure-JAX replica (same RNG draws, same math) for a sanity check."""
    B, C, H, W = x.shape
    k_apply, k_size, k_angle = jax.random.split(key, 3)
    apply_flag = jax.random.uniform(k_apply, ()) < prob
    size_rand = jax.random.uniform(k_size, ()) * (size[1] - size[0]) + size[0]
    idx_thr = jnp.ceil(H * (1.0 - size_rand))
    angle_deg = jax.random.uniform(k_angle, ()) * 360.0 - 180.0
    theta = angle_deg * (jnp.pi / 180.0)
    cos_t, sin_t = jnp.cos(theta), jnp.sin(theta)

    yy, xx = jnp.meshgrid(jnp.arange(H, dtype=jnp.float32),
                          jnp.arange(W, dtype=jnp.float32), indexing="ij")
    cy, cx = (H - 1) * 0.5, (W - 1) * 0.5
    dy, dx = yy - cy, xx - cx
    sx = jnp.round(cos_t * dx + sin_t * dy + cx)
    sy = jnp.round(-sin_t * dx + cos_t * dy + cy)
    keep = (sx >= 0) & (sx <= W - 1) & (sy >= 0) & (sy <= H - 1) & (sy < idx_thr)
    mask = keep.astype(x.dtype)
    return jnp.where(apply_flag, x * mask[None, None, :, :], x)


if __name__ == "__main__":
    key = jax.random.PRNGKey(0)
    k_data, k_aug = jax.random.split(key)
    x = jax.random.normal(k_data, (2, 4, 16, 16), dtype=jnp.float32)

    ref = _reference(x, k_aug, prob=0.5, size=(0.3, 0.5))

    # Production callers that own `x` should add donate_argnums=(0,) here so the
    # identity branch / in-place apply avoid any extra HBM allocation.
    occlude = jax.jit(random_occlusion, static_argnames=("prob", "size"))
    out = occlude(x, k_aug, prob=0.5, size=(0.3, 0.5))
    out = jax.block_until_ready(out)

    assert out.shape == x.shape and out.dtype == x.dtype
    assert jnp.allclose(out, ref, atol=1e-6), "mismatch vs pure-JAX reference"
    print("KERNEL_OK")
</pallas_src>

<mosaic_0001>
module attributes {stable_mosaic.version = 11 : i64} {
  func.func @_occlusion_kernel(%arg0: i32, %arg1: i32, %arg2: memref<8x256xf32, #tpu.memory_space<vmem>>, %arg3: memref<1x256xf32, #tpu.memory_space<vmem>>, %arg4: memref<8x256xf32, #tpu.memory_space<vmem>>) attributes {dimension_semantics = [#tpu.dimension_semantics<parallel>, #tpu.dimension_semantics<parallel>], iteration_bounds = array<i64: 1, 1>, scalar_prefetch = 0 : i64, scratch_operands = 0 : i64, tpu.core_type = #tpu.core_type<tc>, window_params = [{transform_indices = @transform_0, window_bounds = array<i64: 8, 256>}, {transform_indices = @transform_1, window_bounds = array<i64: 1, 256>}, {transform_indices = @transform_2, window_bounds = array<i64: 8, 256>}]} {
    %c0 = arith.constant 0 : index
    %c0_0 = arith.constant 0 : index
    %0 = vector.load %arg2[%c0, %c0_0] : memref<8x256xf32, #tpu.memory_space<vmem>>, vector<8x256xf32>
    %c0_1 = arith.constant 0 : index
    %c0_2 = arith.constant 0 : index
    %1 = vector.load %arg3[%c0_1, %c0_2] : memref<1x256xf32, #tpu.memory_space<vmem>>, vector<1x256xf32>
    %2 = vector.broadcast %1 : vector<1x256xf32> to vector<8x256xf32>
    %3 = arith.mulf %0, %2 : vector<8x256xf32>
    %c0_3 = arith.constant 0 : index
    %c0_4 = arith.constant 0 : index
    %4 = vector.load %arg4[%c0_3, %c0_4] : memref<8x256xf32, #tpu.memory_space<vmem>>, vector<8x256xf32>
    tpu.vector_store %arg4[%c0_3, %c0_4], %3 {strides = array<i32>} : memref<8x256xf32, #tpu.memory_space<vmem>>, vector<8x256xf32>,
    return
  }
  func.func @transform_0(%arg0: i32, %arg1: i32) -> (i32, i32) {
    %c0_i32 = arith.constant 0 : i32
    return %arg0, %arg1 : i32, i32
  }
  func.func @transform_1(%arg0: i32, %arg1: i32) -> (i32, i32) {
    %c0_i32 = arith.constant 0 : i32
    %c0_i32_0 = arith.constant 0 : i32
    return %c0_i32, %arg1 : i32, i32
  }
  func.func @transform_2(%arg0: i32, %arg1: i32) -> (i32, i32) {
    %c0_i32 = arith.constant 0 : i32
    return %arg0, %arg1 : i32, i32
  }
}

</mosaic_0001>

<bundles_post_ra>
// kernel: branch_1_fun.1
= control target key start
LH: loop header
LB: loop body
LE: loop exit
PB: predicated region body
PF: predicated region fallthrough
CT: control target
= control target key end

     0   :  { %v15_v0 = vlaneseq  ;;  %s63_s1 = inlined_call_operand.vmem [shape: f32[1,256], index: 1, kind: input, shape index: {}]   ;;  %s64_s0 = inlined_call_operand.vmem [shape: f32[8,256], index: 0, kind: input, shape index: {}, may-alias: {0,2}]   ;;  %s65_s2 = inlined_call_operand.vmem [shape: f32[8,256], index: 2, kind: output, shape index: {}, may-alias: {0,2}]  }
   0x1   :  { %v13_v2 = vld [vmem:[%s63_s1] sm:$0x3]  ;;  %v12_v6 = vld [vmem:[%s64_s0 + $0x8] sm:$0xff] }
   0x2   :  { %v16_v1 = vshrl.u32 %v15_v0, 7  ;;  %v11_v5 = vld [vmem:[%s64_s0] sm:$0xff] }
   0x4   :  { %v17_v3 = vsub.s32 0, %v16_v1  ;;  %v21_v4 = vsub.s32 1, %v16_v1 }
   0x6   :  { %v18_v7 = vrot.slane %v13_v2, %v17_v3  ;;  %v22_v8 = vrot.slane %v13_v2, %v21_v4 }
   0x8   :  { %v25_v9 = vmul.f32 %v18_v7, %v11_v5  ;;  %v26_v10 = vmul.f32 %v22_v8, %v12_v6 }
   0xa   :  { %27 = vst [vmem:[%s65_s2] sm:$0xff] %v25_v9  ;;  %28 = vst [vmem:[%s65_s2 + $0x8] sm:$0xff] %v26_v10 }

</bundles_post_ra>
